<compile_context>
chip_gen: v5e
topology: v5e:2x2
jax: 0.10.0
libtpu: 0.0.40
codegen_flags: <defaults>
</compile_context>

<pallas_src>
import functools

import jax
import jax.numpy as jnp
from jax.experimental import pallas as pl
from jax.experimental.pallas import tpu as pltpu


def _round_up(x, m):
    return ((x + m - 1) // m) * m


# Conservative per-kernel weight budget (bf16 bytes): assuming 2 VMEM buffers
# per weight this keeps a chunk under ~48 MiB, fitting v7x's 64 MiB/TC VMEM.
_WEIGHT_CHUNK_BUDGET_BYTES = 20 * 1024 * 1024
# Only bother requesting single-buffered weights when they are big enough to matter.
_SINGLE_BUFFER_THRESHOLD_BYTES = 4 * 1024 * 1024


# ---------------------------------------------------------------------------
# Kernel body: a fused chunk of consecutive bias-free layers.
#   h = (tanh(x) if act_on_input else x) @ W0 ; h = tanh(h) @ W1 ; ...
# Matmuls take bf16 operands and accumulate in fp32 on the MXU; tanh runs in
# fp32 on the EUP (safe on v5e, which has no bf16 EUP).
# ---------------------------------------------------------------------------
def _mlp_chunk_kernel(*refs, num_weights, act_on_input):
    x_ref = refs[0]
    w_refs = refs[1:1 + num_weights]
    o_ref = refs[1 + num_weights]

    if act_on_input:
        h = jnp.tanh(x_ref[...].astype(jnp.float32)).astype(jnp.bfloat16)
    else:
        h = x_ref[...].astype(jnp.bfloat16)
    h = jnp.dot(h, w_refs[0][...], preferred_element_type=jnp.float32)
    for w_ref in w_refs[1:]:
        h = jnp.dot(jnp.tanh(h).astype(jnp.bfloat16), w_ref[...],
                    preferred_element_type=jnp.float32)
    o_ref[...] = h.astype(o_ref.dtype)


def _run_chunk(x_pad, weights, *, act_on_input, out_dtype, tm, single_buffer):
    """One fused pallas_call over a consecutive group of layers."""
    m_pad, k_pad = x_pad.shape
    n_pad = weights[-1].shape[1]
    grid_m = m_pad // tm
    num_w = len(weights)

    kernel = functools.partial(
        _mlp_chunk_kernel, num_weights=num_w, act_on_input=act_on_input)

    in_specs = [pl.BlockSpec((tm, k_pad), lambda i: (i, 0))]
    for w in weights:
        di, do = w.shape
        if single_buffer:
            # Constant index_map: the weight block never changes across grid
            # steps, so one VMEM buffer suffices (halves weight VMEM vs the
            # default double buffering -> matters on v7x's 64 MiB VMEM).
            spec = pl.BlockSpec((di, do), lambda i: (0, 0),
                                pipeline_mode=pl.Buffered(1))
        else:
            spec = pl.BlockSpec((di, do), lambda i: (0, 0))
        in_specs.append(spec)
    out_specs = pl.BlockSpec((tm, n_pad), lambda i: (i, 0))

    # Explicit VMEM budget: buffered weights + double-buffered act/out tiles.
    weight_bytes = sum(int(w.size) * w.dtype.itemsize for w in weights)
    weight_bufs = 1 if single_buffer else 2
    out_itemsize = jnp.dtype(out_dtype).itemsize
    need = (weight_bufs * weight_bytes
            + 2 * tm * k_pad * x_pad.dtype.itemsize
            + 2 * tm * n_pad * out_itemsize)
    vmem_limit = int(min(max(need + (8 << 20), 32 << 20), 112 << 20))

    # Advisory cost estimate for XLA's scheduler.
    flops = 2 * m_pad * sum(int(w.shape[0]) * int(w.shape[1]) for w in weights)
    transcendentals = m_pad * sum(int(w.shape[0]) for w in weights[1:])
    if act_on_input:
        transcendentals += m_pad * k_pad
    bytes_accessed = (int(x_pad.size) * x_pad.dtype.itemsize
                      + weight_bytes + m_pad * n_pad * out_itemsize)

    return pl.pallas_call(
        kernel,
        out_shape=jax.ShapeDtypeStruct((m_pad, n_pad), out_dtype),
        grid=(grid_m,),
        in_specs=in_specs,
        out_specs=out_specs,
        compiler_params=pltpu.CompilerParams(
            dimension_semantics=("parallel",),
            vmem_limit_bytes=vmem_limit,
        ),
        cost_estimate=pl.CostEstimate(
            flops=int(flops),
            transcendentals=int(transcendentals),
            bytes_accessed=int(bytes_accessed),
        ),
    )(x_pad, *weights)


def _run_chunk_safe(x_pad, weights, *, act_on_input, out_dtype, tm, single_buffer):
    """Try single-buffered weights; fall back to default buffering if unsupported."""
    if single_buffer:
        try:
            return _run_chunk(x_pad, weights, act_on_input=act_on_input,
                              out_dtype=out_dtype, tm=tm, single_buffer=True)
        except Exception:
            pass  # pl.Buffered(1) unsupported on this jax build -> default buffering.
    return _run_chunk(x_pad, weights, act_on_input=act_on_input,
                      out_dtype=out_dtype, tm=tm, single_buffer=False)


def _choose_tm(m, tm):
    m8 = _round_up(m, 8)
    if tm is not None:
        return min(_round_up(tm, 8), m8)
    # Target ~512-row tiles (amortizes the ~0.35 us per-step pipeline overhead),
    # but keep >= 2 grid steps when the batch is big enough that splitting the
    # "parallel" axis across v7x's 2 TensorCores pays off.
    target = 512
    nsteps = max(pl.cdiv(m8, target), 2 if m8 > 256 else 1)
    return _round_up(pl.cdiv(m8, nsteps), 8)


def _split_weight_chunks(weights, budget_bytes):
    chunks, cur, cur_bytes = [], [], 0
    for w in weights:
        wb = int(w.size) * w.dtype.itemsize
        if cur and cur_bytes + wb > budget_bytes:
            chunks.append(cur)
            cur, cur_bytes = [], 0
        cur.append(w)
        cur_bytes += wb
    chunks.append(cur)
    return chunks


def mlp_forward(x, padded_weights, out_size, *, tm=None):
    """Fused bias-free tanh-MLP forward. `padded_weights` are bf16, lane-padded (in,out)."""
    m, k = x.shape
    k_pad = padded_weights[0].shape[0]
    n_pad = padded_weights[-1].shape[1]
    assert k <= k_pad and out_size <= n_pad

    tm = _choose_tm(m, tm)
    m_pad = _round_up(m, tm)

    # Pad fused with the bf16 cast (no fp32 round trip). Zero padding is exact:
    # padded weight rows/cols are zero and tanh(0) == 0.
    x_pad = jnp.zeros((m_pad, k_pad), jnp.bfloat16).at[:m, :k].set(
        x.astype(jnp.bfloat16))

    # Usually a single chunk == the whole network in one pallas_call; chunking
    # only triggers when the weight set would not fit v7x's per-TC VMEM.
    chunks = _split_weight_chunks(padded_weights, _WEIGHT_CHUNK_BUDGET_BYTES)
    h = x_pad
    for ci, chunk in enumerate(chunks):
        chunk_bytes = sum(int(w.size) * w.dtype.itemsize for w in chunk)
        h = _run_chunk_safe(
            h, chunk,
            act_on_input=(ci > 0),
            out_dtype=jnp.float32,   # final output + inter-chunk activations in fp32
            tm=tm,
            single_buffer=chunk_bytes >= _SINGLE_BUFFER_THRESHOLD_BYTES,
        )

    # Slice away batch-row and lane padding.
    return h[:m, :out_size]


class LinearNNWithActivationPallas:
    """JAX/Pallas port of linearNN_with_activation (bias-free MLP, activation=tanh)."""

    # TODO(synk): the PyTorch init_layer schemes (init=int / 'all_ones') are not
    # ported; forward semantics use freshly sampled nn.Linear-style weights.

    def __init__(self, inp_size, out_size, widths, key):
        self.widths = list(widths)
        self.out_size = out_size
        dims = [inp_size] + list(widths) + [out_size]
        keys = jax.random.split(key, len(dims) - 1)

        self.weights = []          # exact fp32 (in, out) weights, for the reference
        self.padded_weights = []   # bf16, lane-padded to multiples of 128
        for i, kk in enumerate(keys):
            fan_in, fan_out = dims[i], dims[i + 1]
            bound = 1.0 / (fan_in ** 0.5)
            w = jax.random.uniform(
                kk, (fan_in, fan_out), dtype=jnp.float32, minval=-bound, maxval=bound)
            self.weights.append(w)
            pi, po = _round_up(fan_in, 128), _round_up(fan_out, 128)
            w_pad = jnp.zeros((pi, po), jnp.bfloat16).at[:fan_in, :fan_out].set(
                w.astype(jnp.bfloat16))
            self.padded_weights.append(w_pad)

    def __call__(self, inp, *, tm=None):
        return mlp_forward(inp, self.padded_weights, self.out_size, tm=tm)

    def reference(self, inp):
        """Pure-JAX fp32 reference for correctness checking."""
        x = inp @ self.weights[0]
        for w in self.weights[1:-1]:
            x = jnp.tanh(x) @ w
        x = jnp.tanh(x) @ self.weights[-1]
        return x


if __name__ == "__main__":
    key = jax.random.PRNGKey(0)
    k_inp, k_params = jax.random.split(key)

    batch = 8
    inp_size = 32
    widths = [64, 64]
    out_size = 16

    model = LinearNNWithActivationPallas(inp_size, out_size, widths, k_params)
    x = jax.random.normal(k_inp, (batch, inp_size), dtype=jnp.float32)

    out = jax.block_until_ready(model(x))
    ref = model.reference(x)

    assert out.shape == (batch, out_size)
    # bf16 matmul operands (fp32 accumulation) vs. the fp32 reference -> relaxed tol.
    assert jnp.allclose(out, ref, atol=3e-2, rtol=3e-2), float(
        jnp.max(jnp.abs(out - ref)))

    print("KERNEL_OK")
</pallas_src>

<mosaic_0001>
module attributes {stable_mosaic.version = 11 : i64} {
  func.func @_mlp_chunk_kernel(%arg0: i32, %arg1: memref<8x128xbf16, #tpu.memory_space<vmem>>, %arg2: memref<128x128xbf16, #tpu.memory_space<vmem>>, %arg3: memref<128x128xbf16, #tpu.memory_space<vmem>>, %arg4: memref<128x128xbf16, #tpu.memory_space<vmem>>, %arg5: memref<8x128xf32, #tpu.memory_space<vmem>>) attributes {dimension_semantics = [#tpu.dimension_semantics<parallel>], iteration_bounds = array<i64: 1>, scalar_prefetch = 0 : i64, scratch_operands = 0 : i64, tpu.core_type = #tpu.core_type<tc>, window_params = [{transform_indices = @transform_0, window_bounds = array<i64: 8, 128>}, {pipeline_mode = #tpu.pipeline_mode<synchronous>, transform_indices = @transform_1, window_bounds = array<i64: 128, 128>}, {pipeline_mode = #tpu.pipeline_mode<synchronous>, transform_indices = @transform_2, window_bounds = array<i64: 128, 128>}, {pipeline_mode = #tpu.pipeline_mode<synchronous>, transform_indices = @transform_3, window_bounds = array<i64: 128, 128>}, {transform_indices = @transform_4, window_bounds = array<i64: 8, 128>}]} {
    %c0 = arith.constant 0 : index
    %c0_0 = arith.constant 0 : index
    %0 = vector.load %arg1[%c0, %c0_0] : memref<8x128xbf16, #tpu.memory_space<vmem>>, vector<8x128xbf16>
    %c0_1 = arith.constant 0 : index
    %c0_2 = arith.constant 0 : index
    %1 = vector.load %arg2[%c0_1, %c0_2] : memref<128x128xbf16, #tpu.memory_space<vmem>>, vector<128x128xbf16>
    %cst = arith.constant dense<0.000000e+00> : vector<8x128xf32>
    %2 = tpu.matmul %0, %1, %cst {dimension_numbers = #tpu.dot_dimension_numbers<[1], [0], [0], [1], [0, 0, 1, 1], [], []>} : vector<8x128xbf16>, vector<128x128xbf16>, vector<8x128xf32> -> vector<8x128xf32>
    %3 = math.tanh %2 : vector<8x128xf32>
    %4 = arith.truncf %3 : vector<8x128xf32> to vector<8x128xbf16>
    %c0_3 = arith.constant 0 : index
    %c0_4 = arith.constant 0 : index
    %5 = vector.load %arg3[%c0_3, %c0_4] : memref<128x128xbf16, #tpu.memory_space<vmem>>, vector<128x128xbf16>
    %cst_5 = arith.constant dense<0.000000e+00> : vector<8x128xf32>
    %6 = tpu.matmul %4, %5, %cst_5 {dimension_numbers = #tpu.dot_dimension_numbers<[1], [0], [0], [1], [0, 0, 1, 1], [], []>} : vector<8x128xbf16>, vector<128x128xbf16>, vector<8x128xf32> -> vector<8x128xf32>
    %7 = math.tanh %6 : vector<8x128xf32>
    %8 = arith.truncf %7 : vector<8x128xf32> to vector<8x128xbf16>
    %c0_6 = arith.constant 0 : index
    %c0_7 = arith.constant 0 : index
    %9 = vector.load %arg4[%c0_6, %c0_7] : memref<128x128xbf16, #tpu.memory_space<vmem>>, vector<128x128xbf16>
    %cst_8 = arith.constant dense<0.000000e+00> : vector<8x128xf32>
    %10 = tpu.matmul %8, %9, %cst_8 {dimension_numbers = #tpu.dot_dimension_numbers<[1], [0], [0], [1], [0, 0, 1, 1], [], []>} : vector<8x128xbf16>, vector<128x128xbf16>, vector<8x128xf32> -> vector<8x128xf32>
    %c0_9 = arith.constant 0 : index
    %c0_10 = arith.constant 0 : index
    %11 = vector.load %arg5[%c0_9, %c0_10] : memref<8x128xf32, #tpu.memory_space<vmem>>, vector<8x128xf32>
    tpu.vector_store %arg5[%c0_9, %c0_10], %10 {strides = array<i32>} : memref<8x128xf32, #tpu.memory_space<vmem>>, vector<8x128xf32>,
    return
  }
  func.func @transform_0(%arg0: i32) -> (i32, i32) {
    %c0_i32 = arith.constant 0 : i32
    %c0_i32_0 = arith.constant 0 : i32
    return %arg0, %c0_i32 : i32, i32
  }
  func.func @transform_1(%arg0: i32) -> (i32, i32) {
    %c0_i32 = arith.constant 0 : i32
    %c0_i32_0 = arith.constant 0 : i32
    %c0_i32_1 = arith.constant 0 : i32
    return %c0_i32, %c0_i32_0 : i32, i32
  }
  func.func @transform_2(%arg0: i32) -> (i32, i32) {
    %c0_i32 = arith.constant 0 : i32
    %c0_i32_0 = arith.constant 0 : i32
    %c0_i32_1 = arith.constant 0 : i32
    return %c0_i32, %c0_i32_0 : i32, i32
  }
  func.func @transform_3(%arg0: i32) -> (i32, i32) {
    %c0_i32 = arith.constant 0 : i32
    %c0_i32_0 = arith.constant 0 : i32
    %c0_i32_1 = arith.constant 0 : i32
    return %c0_i32, %c0_i32_0 : i32, i32
  }
  func.func @transform_4(%arg0: i32) -> (i32, i32) {
    %c0_i32 = arith.constant 0 : i32
    %c0_i32_0 = arith.constant 0 : i32
    return %arg0, %c0_i32 : i32, i32
  }
}

</mosaic_0001>

<bundles_post_ra>
// kernel: tpu_custom_call.1
= control target key start
LH: loop header
LB: loop body
LE: loop exit
PB: predicated region body
PF: predicated region fallthrough
CT: control target
= control target key end

     0   :  { %9 = vsyncpa [#allocation3], 0  ;;  %s641_s0 = inlined_call_operand.hbm [shape: bf16[8,128], index: 0, kind: input, shape index: {}]   ;;  %s642_s1 = inlined_call_operand.hbm [shape: bf16[128,128], index: 1, kind: input, shape index: {}]   ;;  %s643_s2 = inlined_call_operand.hbm [shape: bf16[128,128], index: 2, kind: input, shape index: {}]   ;;  %s644_s3 = inlined_call_operand.hbm [shape: bf16[128,128], index: 3, kind: input, shape index: {}]   ;;  %s645_s4 = inlined_call_operand.hbm [shape: f32[8,128], index: 4, kind: output, shape index: {}]  }
   0x1   :  { %10 = vsyncpa [#allocation6], 0 }
   0x2   :  { %11 = vsyncpa [#allocation9], 0  ;;  %s28_s17 = sshll.u32 %s642_s1, 4  ;;  %s29_s17 = int_to_ptr.hbm [resolvable:$true] %s28_s17 }
   0x3   :  { %12 = vsyncpa [#allocation4], 0  ;;  %s594_s18 = smov [#allocation5]   ;;  %s18_s22 = sshll.u32 %s641_s0, 4  ;;  %s19_s22 = int_to_ptr.hbm [resolvable:$true] %s18_s22 }
   0x4   :  { %s30_s19 = sshll.u32 %s594_s18, 4  ;;  %s595_s23 = smov 64   ;;  %s31_s19 = int_to_ptr.vmem [resolvable:$true] %s30_s19 }
   0x5   :  { %s596_s24 = smov 4   ;;  %s597_s25 = smov [#allocation2]  }
   0x6   :  { %36 = dma.hbm_to_vmem [thread:$0]  %s29_s17, 1024, %s31_s19, [#allocation6], %s595_s23, %s595_s23, %s596_s24  }
   0x7   :  { %s20_s26 = sshll.u32 %s597_s25, 4  ;;  %s41_s29 = sshll.u32 %s643_s2, 4  ;;  %s21_s26 = int_to_ptr.vmem [resolvable:$true] %s20_s26  ;;  %s42_s29 = int_to_ptr.hbm [resolvable:$true] %s41_s29 }
   0x8   :  { %23 = dma.hbm_to_vmem [thread:$0]  %s19_s22, 64, %s21_s26, [#allocation3]  }
   0x9   :  { %s54_s5 = sshll.u32 %s644_s3, 4  ;;  %s598_s6 = smov [#allocation7]   ;;  %s55_s5 = int_to_ptr.hbm [resolvable:$true] %s54_s5 }
   0xa   :  { %s43_s7 = sshll.u32 %s598_s6, 4  ;;  %s599_s0 = smov [#allocation8]   ;;  %s44_s7 = int_to_ptr.vmem [resolvable:$true] %s43_s7 }
   0xb   :  { %49 = dma.hbm_to_vmem [thread:$0]  %s42_s29, 1024, %s44_s7, [#allocation6], %s595_s23, %s595_s23, %s596_s24  }
   0xc   :  { %s56_s8 = sshll.u32 %s599_s0, 4  ;;  %s57_s8 = int_to_ptr.vmem [resolvable:$true] %s56_s8 }
   0xd   :  { %62 = dma.hbm_to_vmem [thread:$0]  %s55_s5, 1024, %s57_s8, [#allocation9], %s595_s23, %s595_s23, %s596_s24  }
   0xe   :  { %586 = dma.done.wait [#allocation3], 64  }
   0xf   :  { %587 = vsyncadd [#allocation3], 4294967232 }
  0x10   :  { %588 = dma.done.wait [#allocation6], 2048  }
  0x11   :  { %589 = vsyncadd [#allocation6], 4294965248 }
  0x12   :  { %590 = dma.done.wait [#allocation9], 1024  }
  0x13   :  { %591 = vsyncadd [#allocation9], 4294966272  ;;  %v438_v0 = vld [vmem:[#allocation5 + $0x38] sm:$0xff]  ;;  %v437_v1 = vld [vmem:[#allocation5 + $0x30] sm:$0xff]  ;;  %s600_s2 = smov [#allocation10]   ;;  %s323_s11 = sshll.u32 %s645_s4, 4  ;;  %s324_s11 = int_to_ptr.hbm [resolvable:$true] %s323_s11 }
  0x14   :  { %144 = vmatpush.bf16.msra.mxu0 %v438_v0  ;;  %v446_v2 = vld [vmem:[#allocation7 + $0x38] sm:$0xff]  ;;  %v445_v3 = vld [vmem:[#allocation7 + $0x30] sm:$0xff]  ;;  %v436_v4 = vld [vmem:[#allocation5 + $0x28] sm:$0xff]  ;;  %s321_s3 = sshll.u32 %s600_s2, 4  ;;  %s322_s3 = int_to_ptr.vmem [resolvable:$true] %s321_s3 }
  0x15   :  { %223 = vmatpush.bf16.msra.mxu1 %v446_v2  ;;  %v444_v5 = vld [vmem:[#allocation7 + $0x28] sm:$0xff]  ;;  %v435_v6 = vld [vmem:[#allocation5 + $0x20] sm:$0xff]  ;;  %v434_v8 = vld [vmem:[#allocation5 + $0x18] sm:$0xff] }
  0x16   :  { %v443_v7 = vld [vmem:[#allocation7 + $0x20] sm:$0xff]  ;;  %v442_v9 = vld [vmem:[#allocation7 + $0x18] sm:$0xff]  ;;  %v433_v10 = vld [vmem:[#allocation5 + $0x10] sm:$0xff] }
  0x17   :  { %v441_v11 = vld [vmem:[#allocation7 + $0x10] sm:$0xff]  ;;  %v432_v12 = vld [vmem:[#allocation5 + $0x8] sm:$0xff]  ;;  %v431_v13 = vld [vmem:[#allocation5] sm:$0xff] }
  0x18   :  { %145 = vmatpush.bf16.msra.mxu0 %v437_v1  ;;  %v79_v14 = vld [vmem:[#allocation2] sm:$0xf]  ;;  %v440_v15 = vld [vmem:[#allocation7 + $0x8] sm:$0xff]  ;;  %v439_v16 = vld [vmem:[#allocation7] sm:$0xff] }
  0x19   :  { %224 = vmatpush.bf16.msra.mxu1 %v445_v3  ;;  %v454_v17 = vld [vmem:[#allocation8 + $0x38] sm:$0xff]  ;;  %v453_v18 = vld [vmem:[#allocation8 + $0x30] sm:$0xff]  ;;  %v452_v19 = vld [vmem:[#allocation8 + $0x28] sm:$0xff] }
  0x1a   :  { %302 = vmatpush.bf16.msra.mxu2 %v454_v17  ;;  %v451_v20 = vld [vmem:[#allocation8 + $0x20] sm:$0xff]  ;;  %v450_v21 = vld [vmem:[#allocation8 + $0x18] sm:$0xff]  ;;  %v449_v22 = vld [vmem:[#allocation8 + $0x10] sm:$0xff] }
  0x1b   :  { %v448_v27 = vld [vmem:[#allocation8 + $0x8] sm:$0xff]  ;;  %v447_v28 = vld [vmem:[#allocation8] sm:$0xff] }
  0x1c   :  { %146 = vmatpush.bf16.msra.mxu0 %v436_v4 }
  0x1d   :  { %225 = vmatpush.bf16.msra.mxu1 %v444_v5 }
  0x1e   :  { %303 = vmatpush.bf16.msra.mxu2 %v453_v18 }
  0x20   :  { %147 = vmatpush.bf16.msra.mxu0 %v435_v6 }
  0x21   :  { %226 = vmatpush.bf16.msra.mxu1 %v443_v7 }
  0x22   :  { %304 = vmatpush.bf16.msra.mxu2 %v452_v19 }
  0x24   :  { %148 = vmatpush.bf16.msra.mxu0 %v434_v8 }
  0x25   :  { %227 = vmatpush.bf16.msra.mxu1 %v442_v9 }
  0x26   :  { %305 = vmatpush.bf16.msra.mxu2 %v451_v20 }
  0x28   :  { %149 = vmatpush.bf16.msra.mxu0 %v433_v10 }
  0x29   :  { %228 = vmatpush.bf16.msra.mxu1 %v441_v11 }
  0x2a   :  { %306 = vmatpush.bf16.msra.mxu2 %v450_v21 }
  0x2c   :  { %150 = vmatpush.bf16.msra.mxu0 %v432_v12 }
  0x2d   :  { %229 = vmatpush.bf16.msra.mxu1 %v440_v15 }
  0x2e   :  { %307 = vmatpush.bf16.msra.mxu2 %v449_v22 }
  0x30   :  { %151 = vmatpush.bf16.msra.mxu0 %v431_v13 }
  0x31   :  { %230 = vmatpush.bf16.msra.mxu1 %v439_v16 }
  0x32   :  { %308 = vmatpush.bf16.msra.mxu2 %v448_v27 }
  0x33   :  { %152 = vmatmul.bf16.vlgmr.msra.gmra.mxu0 %v79_v14 }
  0x36   :  { %309 = vmatpush.bf16.msra.mxu2 %v447_v28 }
  0xb0   :  { %v153_v23 = vpop.f32.mrf.mxu0 }
  0xb1   :  { %462 = vtanh.f32 %v153_v23 }
  0xb7   :  { %v463_v24 = vpop.eup %462 }
  0xb8   :  { %v155_v25 = vpop.f32.mrf.mxu0  ;;  %v158_v26 = vpack.c.bf16 %v463_v24, %v463_v24 }
  0xba   :  { %231 = vmatmul.bf16.vlgmr.msra.gmra.mxu1 %v158_v26 }
 0x137   :  { %v232_v29 = vpop.f32.mrf.mxu1 }
 0x138   :  { %464 = vtanh.f32 %v232_v29 }
 0x13e   :  { %v465_v30 = vpop.eup %464 }
 0x13f   :  { %v234_v31 = vpop.f32.mrf.mxu1  ;;  %v237_v32 = vpack.c.bf16 %v465_v30, %v465_v30 }
 0x141   :  { %310 = vmatmul.bf16.vlgmr.msra.gmra.mxu2 %v237_v32 }
 0x1c4   :  { %v311_v33 = vpop.f32.mrf.mxu2 }
 0x1c5   :  { %315 = vst [vmem:[#allocation10] sm:$0xff] %v311_v33 }
 0x1c6   :  { %326 = dma.vmem_to_hbm [thread:$0]  %s322_s3, 128, %s324_s11, [#allocation4]  }
 0x1cc   :  { %v313_v34 = vpop.f32.mrf.mxu2 }
 0x1cd   :  { %592 = dma.done.wait [#allocation4], 128  }
 0x1ce   :  { %593 = vsyncadd [#allocation4], 4294967168 }
 0x1cf   :  { %331 = vsyncpa [#allocation3], 1 }
 0x1d0   :  { %332 = vsyncpa [#allocation6], 1 }
 0x1d1   :  { %333 = vsyncpa [#allocation9], 1 }
 0x1d2   :  { %334 = vsyncpa [#allocation4], 1 }

</bundles_post_ra>
